<compile_context>
chip_gen: v6e
topology: v6e:2x2x1
jax: 0.10.0
libtpu: 0.0.40
codegen_flags: <defaults>
</compile_context>

<pallas_src>
import functools

import jax
import jax.numpy as jnp
from jax.experimental import pallas as pl
from jax.experimental.pallas import tpu as pltpu


def _layernorm_kernel(x_ref, gamma_ref, beta_ref, o_ref, *, features, epsilon):
    x = x_ref[...].astype(jnp.float32)                     # (rt, F)

    # Single fused sweep: sum and sum-of-squares together.
    s1 = jnp.sum(x, axis=-1, keepdims=True)                # (rt, 1)
    s2 = jnp.sum(x * x, axis=-1, keepdims=True)            # (rt, 1)
    mean = s1 * jnp.float32(1.0 / features)

    # torch.std() default is unbiased (ddof=1); epsilon is added to std, not var.
    # Divisor kept as an array so features == 1 yields NaN (matching torch) instead
    # of a Python ZeroDivisionError at trace time.
    var = (s2 - s1 * mean) / jnp.float32(features - 1)
    var = jnp.maximum(var, 0.0)                            # guard E[x^2]-E[x]^2 cancellation

    # One exact reciprocal per row; per-element work is a VPU multiply, not a divide.
    inv = pl.reciprocal(jnp.sqrt(var) + epsilon)           # (rt, 1)

    out = gamma_ref[...] * ((x - mean) * inv) + beta_ref[...]   # gamma/beta already f32
    o_ref[...] = out.astype(o_ref.dtype)


def _vmem_limit_bytes():
    """Modest explicit VMEM limit (v5e's scoped default is only 16 MiB)."""
    try:
        cap = pltpu.get_tpu_info().vmem_capacity_bytes     # 128 MiB v5e/v6e, 64 MiB v7x
    except Exception:
        cap = 64 * 1024 * 1024                             # conservative (v7x) fallback
    return int(min(64 * 1024 * 1024, (cap * 3) // 4))


def _choose_row_tile(rows, features, itemsize):
    """Sublane-aligned row tile giving ~2 MiB input blocks and >=8 (even) grid steps."""
    if rows <= 8:
        # Single block; a block dim < 8 is only legal when it equals the full array dim.
        return int(rows)
    bytes_per_row = max(features * itemsize, 1)
    # ~2 MiB per input block: mem-bound tiled kernels already reach ~85% of HBM
    # roofline here; bigger blocks only raise VMEM pressure (v7x has 64 MiB total).
    rt = (2 * 1024 * 1024) // bytes_per_row
    # Keep at least ~8 grid steps so the double-buffered pipeline has work to overlap
    # and v7x's two TensorCores each get several blocks.
    rt = min(rt, max(8, rows // 8))
    rt = max(8, (rt // 8) * 8)
    # Prefer an even number of blocks (v7x 2-TC load balance; free on v5e/v6e).
    if pl.cdiv(rows, rt) % 2 == 1:
        for cand in range(rt, max(8, rt - 256) - 1, -8):
            if pl.cdiv(rows, cand) % 2 == 0:
                rt = cand
                break
    return int(rt)


def layer_norm(x, gamma, beta, epsilon=1e-08, row_tile=None):
    """x: (..., features). gamma/beta: (features,). Normalizes over the last axis."""
    orig_shape = x.shape
    features = orig_shape[-1]
    x2d = x.reshape(-1, features)
    rows = x2d.shape[0]

    itemsize = jnp.dtype(x.dtype).itemsize
    if row_tile is None:
        row_tile = _choose_row_tile(rows, features, itemsize)
    n_blocks = pl.cdiv(rows, row_tile)

    # Hoist gamma/beta upcast out of the kernel (they are (1, F) and broadcast anyway).
    gamma2d = gamma.astype(jnp.float32).reshape(1, features)
    beta2d = beta.astype(jnp.float32).reshape(1, features)

    kernel = functools.partial(_layernorm_kernel, features=features, epsilon=epsilon)

    # TODO(synk): for tiny feature dims (< 128 lanes) a lane-dense repack (k rows folded
    # onto lanes + segmented reductions via a block-diagonal MXU matmul) would avoid
    # masked vst.msk stores, but the wrapper-side (rows,F)->(rows/k,k*F) relayout costs
    # an extra HBM pass each way, so it is not applied here.
    out2d = pl.pallas_call(
        kernel,
        out_shape=jax.ShapeDtypeStruct((rows, features), x.dtype),
        grid=(n_blocks,),
        in_specs=[
            # Ragged tail block (rows % row_tile != 0) is masked by Pallas itself;
            # no wrapper pad/slice passes over HBM.
            pl.BlockSpec((row_tile, features), lambda i: (i, 0)),
            pl.BlockSpec((1, features), lambda i: (0, 0)),
            pl.BlockSpec((1, features), lambda i: (0, 0)),
        ],
        out_specs=pl.BlockSpec((row_tile, features), lambda i: (i, 0)),
        compiler_params=pltpu.CompilerParams(
            dimension_semantics=("parallel",),   # shards row blocks across v7x's 2 TCs
            vmem_limit_bytes=_vmem_limit_bytes(),
        ),
    )(x2d, gamma2d, beta2d)

    return out2d.reshape(orig_shape)


def _reference(x, gamma, beta, epsilon):
    # Pure-JAX reference of the same (torch-style) math: unbiased std, eps added to std.
    features = x.shape[-1]
    mean = jnp.mean(x, axis=-1, keepdims=True)
    std = jnp.sqrt(jnp.sum((x - mean) ** 2, axis=-1, keepdims=True) / (features - 1))
    return gamma * ((x - mean) / (std + epsilon)) + beta


if __name__ == "__main__":
    seq, batch, hidden = 8, 2, 32

    # Deterministic parameter init matching the module's __init__:
    # beta = zeros(features), gamma = ones(features)
    gamma = jnp.ones((hidden,), dtype=jnp.float32)
    beta = jnp.zeros((hidden,), dtype=jnp.float32)

    key = jax.random.PRNGKey(0)
    x = jax.random.normal(key, (seq, batch, hidden), dtype=jnp.float32)

    out = layer_norm(x, gamma, beta, epsilon=1e-08)
    out = jax.block_until_ready(out)
    ref = _reference(x, gamma, beta, 1e-08)
    assert jnp.allclose(out, ref, atol=1e-5, rtol=1e-5)

    # Ragged row count (rows % row_tile != 0) exercises the in-kernel tail masking
    # that replaced the wrapper-side pad/slice.
    x2 = jax.random.normal(jax.random.PRNGKey(1), (3, 5, hidden), dtype=jnp.float32)
    out2 = jax.block_until_ready(layer_norm(x2, gamma, beta, epsilon=1e-08))
    ref2 = _reference(x2, gamma, beta, 1e-08)
    assert jnp.allclose(out2, ref2, atol=1e-5, rtol=1e-5)

    print("KERNEL_OK")
</pallas_src>

<mosaic_0001>
module attributes {stable_mosaic.version = 11 : i64} {
  func.func @_layernorm_kernel(%arg0: i32, %arg1: memref<8x32xf32, #tpu.memory_space<vmem>>, %arg2: memref<1x32xf32, #tpu.memory_space<vmem>>, %arg3: memref<1x32xf32, #tpu.memory_space<vmem>>, %arg4: memref<8x32xf32, #tpu.memory_space<vmem>>) attributes {dimension_semantics = [#tpu.dimension_semantics<parallel>], iteration_bounds = array<i64: 2>, scalar_prefetch = 0 : i64, scratch_operands = 0 : i64, tpu.core_type = #tpu.core_type<tc>, window_params = [{transform_indices = @transform_0, window_bounds = array<i64: 8, 32>}, {pipeline_mode = #tpu.pipeline_mode<synchronous>, transform_indices = @transform_1, window_bounds = array<i64: 1, 32>}, {pipeline_mode = #tpu.pipeline_mode<synchronous>, transform_indices = @transform_2, window_bounds = array<i64: 1, 32>}, {transform_indices = @transform_3, window_bounds = array<i64: 8, 32>}]} {
    %c0 = arith.constant 0 : index
    %c0_0 = arith.constant 0 : index
    %0 = vector.load %arg1[%c0, %c0_0] : memref<8x32xf32, #tpu.memory_space<vmem>>, vector<8x32xf32>
    %cst = arith.constant dense<0.000000e+00> : vector<8xf32>
    %1 = vector.multi_reduction <add>, %0, %cst [1] : vector<8x32xf32> to vector<8xf32>
    %2 = vector.shape_cast %1 : vector<8xf32> to vector<8x1xf32>
    %3 = arith.mulf %0, %0 : vector<8x32xf32>
    %cst_1 = arith.constant dense<0.000000e+00> : vector<8xf32>
    %4 = vector.multi_reduction <add>, %3, %cst_1 [1] : vector<8x32xf32> to vector<8xf32>
    %5 = vector.shape_cast %4 : vector<8xf32> to vector<8x1xf32>
    %cst_2 = arith.constant 3.125000e-02 : f32
    %6 = vector.broadcast %cst_2 : f32 to vector<8x1xf32>
    %7 = arith.mulf %2, %6 : vector<8x1xf32>
    %8 = arith.mulf %2, %7 : vector<8x1xf32>
    %9 = arith.subf %5, %8 : vector<8x1xf32>
    %cst_3 = arith.constant 3.100000e+01 : f32
    %10 = vector.broadcast %cst_3 : f32 to vector<8x1xf32>
    %11 = arith.divf %9, %10 : vector<8x1xf32>
    %cst_4 = arith.constant 0.000000e+00 : f32
    %12 = vector.broadcast %cst_4 : f32 to vector<8x1xf32>
    %13 = arith.maximumf %11, %12 : vector<8x1xf32>
    %14 = math.sqrt %13 : vector<8x1xf32>
    %cst_5 = arith.constant 9.99999993E-9 : f32
    %15 = vector.broadcast %cst_5 : f32 to vector<8x1xf32>
    %16 = arith.addf %14, %15 : vector<8x1xf32>
    %17 = tpu.reciprocal %16 : vector<8x1xf32> -> vector<8x1xf32>
    %c0_6 = arith.constant 0 : index
    %c0_7 = arith.constant 0 : index
    %18 = vector.load %arg2[%c0_6, %c0_7] : memref<1x32xf32, #tpu.memory_space<vmem>>, vector<1x32xf32>
    %19 = vector.broadcast %7 : vector<8x1xf32> to vector<8x32xf32>
    %20 = arith.subf %0, %19 : vector<8x32xf32>
    %21 = vector.broadcast %17 : vector<8x1xf32> to vector<8x32xf32>
    %22 = arith.mulf %20, %21 : vector<8x32xf32>
    %23 = vector.broadcast %18 : vector<1x32xf32> to vector<8x32xf32>
    %24 = arith.mulf %23, %22 : vector<8x32xf32>
    %c0_8 = arith.constant 0 : index
    %c0_9 = arith.constant 0 : index
    %25 = vector.load %arg3[%c0_8, %c0_9] : memref<1x32xf32, #tpu.memory_space<vmem>>, vector<1x32xf32>
    %26 = vector.broadcast %25 : vector<1x32xf32> to vector<8x32xf32>
    %27 = arith.addf %24, %26 : vector<8x32xf32>
    %c0_10 = arith.constant 0 : index
    %c0_11 = arith.constant 0 : index
    %28 = vector.load %arg4[%c0_10, %c0_11] : memref<8x32xf32, #tpu.memory_space<vmem>>, vector<8x32xf32>
    tpu.vector_store %arg4[%c0_10, %c0_11], %27 {strides = array<i32>} : memref<8x32xf32, #tpu.memory_space<vmem>>, vector<8x32xf32>,
    return
  }
  func.func @transform_0(%arg0: i32) -> (i32, i32) {
    %c0_i32 = arith.constant 0 : i32
    %c0_i32_0 = arith.constant 0 : i32
    return %arg0, %c0_i32 : i32, i32
  }
  func.func @transform_1(%arg0: i32) -> (i32, i32) {
    %c0_i32 = arith.constant 0 : i32
    %c0_i32_0 = arith.constant 0 : i32
    %c0_i32_1 = arith.constant 0 : i32
    return %c0_i32, %c0_i32_0 : i32, i32
  }
  func.func @transform_2(%arg0: i32) -> (i32, i32) {
    %c0_i32 = arith.constant 0 : i32
    %c0_i32_0 = arith.constant 0 : i32
    %c0_i32_1 = arith.constant 0 : i32
    return %c0_i32, %c0_i32_0 : i32, i32
  }
  func.func @transform_3(%arg0: i32) -> (i32, i32) {
    %c0_i32 = arith.constant 0 : i32
    %c0_i32_0 = arith.constant 0 : i32
    return %arg0, %c0_i32 : i32, i32
  }
}

</mosaic_0001>

<bundles_post_ra>
// kernel: tpu_custom_call.1
= control target key start
LH: loop header
LB: loop body
LE: loop exit
PB: predicated region body
PF: predicated region fallthrough
CT: control target
= control target key end

     0   :  { %8 = vsyncpa [#allocation3], 0  ;;  %s647_s0 = inlined_call_operand.hbm [shape: f32[16,32], index: 0, kind: input, shape index: {}]   ;;  %s648_s1 = inlined_call_operand.vmem [shape: f32[1,32], index: 1, kind: input, shape index: {}]   ;;  %s649_s2 = inlined_call_operand.vmem [shape: f32[1,32], index: 2, kind: input, shape index: {}]   ;;  %s650_s3 = inlined_call_operand.hbm [shape: f32[16,32], index: 3, kind: output, shape index: {}]  }
   0x1   :  { %10 = vsyncpa [#allocation3 + $0x1], 0 }
   0x2   :  { %11 = vsyncpa [#allocation4], 0 }
   0x3   :  { %13 = vsyncpa [#allocation4 + $0x1], 0  ;;  %s493_s12 = smov 0   ;;  %s495_s13 = smov 0  }
   0x4   :  { %s497_s14 = smov 0   ;;  %s499_s15 = smov 0  }
   0x5 LB: > { %s514_s16 = sadd.s32 4294967295, %s469_s15   ;;  %s313_s17 = sadd.s32 4294967294, %s469_s15   ;;  %s469_s15 = sphi %s499_s15, %s667_s15   ;;  %s465_s14 = sphi %s497_s14, %s666_s14   ;;  %s461_s13 = sphi %s495_s13, %s665_s13   ;;  %s457_s12 = sphi %s493_s12, %s664_s12  }
   0x6   : > { %s518_s18 = sadd.s32 1, %s469_s15   ;;  %s26_s19 = sadd.s32 1, %s465_s14 }
   0x7   : > { %s23_s20 = ssub.s32 %s469_s15, %s518_s18  ;;  %p33_p0 = scmp.ne.s32.totalorder %s465_s14, %s461_s13 }
   0x8   : > { %p24_p1 = scmp.eq.s32.totalorder %s23_s20, 0  ;;  %p34_p2 = scmp.eq.s32.totalorder %s469_s15, 0 }
   0x9   : > { %p39_p3 = scmp.ne.s32.totalorder %s461_s13, %s457_s12  ;;  %p40_p4 = scmp.eq.s32.totalorder %s514_s16, 0 }
   0xa   : > { %s530_s21 = scalar_select %p24_p1, %s465_s14, %s26_s19  }
   0xb   : > { %p532_p5 = por %p34_p2, %p33_p0  ;;  %p536_p6 = por %p40_p4, %p39_p3 }
   0xc   : > { %p105_p7 = scmp.eq.s32.totalorder %s514_s16, 1  ;;  %p111_p8 = scmp.eq.s32.totalorder %s313_s17, 1 }
   0xd   : > { %s654_s23 = scalar_select %p536_p6, 1, 0 }
   0xe   : > { %p339_p10 = scmp.lt.s32.totalorder %s469_s15, 2  ;;  %p543_p11 = por %p105_p7, %p33_p0 }
   0xf   : > { %p547_p12 = por %p111_p8, %p39_p3  ;;  %s137_s26 = sand.u32 1, %s465_s14  }
  0x10   : > { %s655_s24 = scalar_select %p543_p11, 1, 0 }
  0x11   : > { %s656_s25 = scalar_select %p547_p12, 1, 0 }
  0x12   : > { %s317_s27 = sshll.u32 %s469_s15, 7  ;;  %s316_s28 = sshll.u32 %s137_s26, 3 }
  0x13   : > { %s556_s4 = scalar_lea.hbm %s647_s0, %s317_s27  ;;  %s141_s5 = scalar_lea.vmem [#allocation2], %s316_s28 }
  0x14   : > { %s148_s6 = sshll.u32 %s141_s5, 4  ;;  %p560_p13 = pnand %p339_p10, %p532_p5  ;;  %s564_s6 = int_to_ptr.vmem [resolvable:$true] %s148_s6 }
  0x15   : > { %s138_s8 = scalar_lea.sflag [#allocation3], %s137_s26  ;;  %s377_s9 = scalar_lea.hbm %s556_s4, 128 }
  0x16   : > { %p378_p2 = scmp.ne.s32.totalorder %s556_s4, %s377_s9  ;;  %p379_p3 = pneg %p560_p13 }
  0x17   : > { %s382_s17 = scalar_lea.hbm %s647_s0, 256  ;;  %p383_p5 = scmp.lt.s32.totalorder %s556_s4, %s647_s0 }
  0x18   : > { %p380_p4 = pnand %p379_p3, %p378_p2  ;;  %p384_p8 = scmp.lt.s32.totalorder %s382_s17, %s377_s9 }
  0x1a   : > { %p381_p7 = pneg %p380_p4  ;;  %p385_p10 = por %p384_p8, %p383_p5 }
  0x1c   : > { %p386_p9 = pnand %p385_p10, %p381_p7 }
  0x1e   : > { %389 = shalt.err (!%p386_p9)
}
  0x1f   : > { %s390_s22 = scalar_lea.vmem %s564_s6, 128  ;;  %s471_s26 = smov [#allocation2]  }
  0x20   : > { %p391_p0 = scmp.ne.s32.totalorder %s564_s6, %s390_s22  ;;  %s395_s27 = sshll.u32 %s471_s26, 4  ;;  %s396_s27 = int_to_ptr.vmem [resolvable:$false] %s395_s27 }
  0x21   : > { %s397_s28 = scalar_lea.vmem %s396_s27, 256  ;;  %p398_p4 = scmp.lt.s32.totalorder %s564_s6, %s396_s27 }
  0x22   : > { %p393_p1 = pnand %p391_p0, %p379_p3  ;;  %p399_p12 = scmp.lt.s32.totalorder %s397_s28, %s390_s22 }
  0x24   : > { %p394_p2 = pneg %p393_p1  ;;  %p400_p11 = por %p399_p12, %p398_p4 }
  0x26   : > { %p401_p6 = pnand %p400_p11, %p394_p2 }
  0x28   : > { %404 = shalt.err (!%p401_p6)
}
  0x29   : > { %334 = dma.hbm_to_vmem [thread:$0]  (!%p560_p13), %s556_s4, 128, %s564_s6, %s138_s8  }
  0x2a   : > { %p658_p9 = scmp.lt.s32.totalorder %s469_s15, 3  ;;  %p659_p7 = scmp.ge.s32.totalorder %s469_s15, 1 }
  0x2c   : > { %p154_p0 = pnand %p659_p7, %p658_p9 }
  0x2d   : > { %s591_s29 = sand.u32 (!%p154_p0), 1, %s461_s13   ;;  %p660_p6 = scmp.ne.s32.totalorder (!%p154_p0), %s654_s23, 0 }
  0x2e   : > { %157 = sbr.rel (%p154_p0) target bundleno = 255 (0xff), region = 32  ;;  %s319_s30 = sshll.u32 (!%p154_p0), %s591_s29, 3 }
  0x2f   : > { %s160_s5 = scalar_lea.sflag (!%p154_p0), [#allocation3], %s591_s29  ;;  %s163_s7 = scalar_lea.vmem (!%p154_p0), [#allocation2], %s319_s30 }
  0x33   : > { %448 = dma.done.wait (%p660_p6), %s160_s5, 128  }
  0x34   : > { %450 = vsyncadd (%p660_p6), %s160_s5, 4294967168  ;;  %vm187_vm0 = vcmask 261120   ;;  %v186_v0 = vld [vmem:[%s163_s7] sm:$0xff]  ;;  %s324_s9 = sshll.u32 %s514_s16, 7  ;;  %s185_s10 = scalar_lea.vmem [#allocation5], %s319_s30 }
  0x35   : > { %v188_v1 = vsel %vm187_vm0, %v186_v0, 0.0  ;;  %v191_v2 = vmul.f32 %v186_v0, %v186_v0  ;;  %v321_v19 = vld [vmem:[%s648_s1] ss:$0 sm:$0xff]  ;;  %s243_s11 = sshll.u32 %s185_s10, 4  ;;  %s241_s20 = scalar_lea.hbm %s650_s3, %s324_s9  ;;  %s244_s11 = int_to_ptr.vmem [resolvable:$true] %s243_s11 }
  0x36   : > { %189 = vadd.xlane.f32.xlu0 %v188_v1  ;;  %v322_v21 = vld [vmem:[%s649_s2] ss:$0 sm:$0xff]  ;;  %s230_s22 = scalar_lea.sflag [#allocation4], %s591_s29  ;;  %s405_s26 = scalar_lea.vmem %s244_s11, 128 }
  0x37   : > { %v192_v3 = vsel %vm187_vm0, %v191_v2, 0.0  ;;  %p406_p11 = scmp.ne.s32.totalorder %s244_s11, %s405_s26  ;;  %p661_p12 = scmp.ne.s32.totalorder %s655_s24, 0 }
  0x38   : > { %s472_s27 = smov [#allocation5]  }
  0x39   : > { %p407_p13 = pnand %p406_p11, %p661_p12  ;;  %s409_s16 = sshll.u32 %s472_s27, 4  ;;  %s410_s16 = int_to_ptr.vmem [resolvable:$false] %s409_s16 }
  0x3a   : > { %193 = vadd.xlane.f32.xlu0 %v192_v3  ;;  %s411_s28 = scalar_lea.vmem %s410_s16, 256  ;;  %p412_p3 = scmp.lt.s32.totalorder %s244_s11, %s410_s16 }
  0x3b   : > { %p408_p1 = pneg %p407_p13  ;;  %p413_p5 = scmp.lt.s32.totalorder %s411_s28, %s405_s26 }
  0x3d   : > { %p414_p8 = por %p413_p5, %p412_p3 }
  0x3f   : > { %p415_p10 = pnand %p414_p8, %p408_p1 }
  0xbf   : > { %v190_v4 = vpop.xlane.xlu0 %189 }
  0xc0   : > { %v195_v5 = vmul.f32 0.03125, %v190_v4 }
  0xc2   : > { %v196_v6 = vmul.f32 %v195_v5, %v190_v4  ;;  %v211_v17 = vsub.f32 %v186_v0, %v195_v5 }
  0xc3   : > { %v194_v7 = vpop.xlane.xlu0 %193 }
  0xc4   : > { %v197_v8 = vsub.f32 %v194_v7, %v196_v6 }
  0xc6   : > { %v199_v9 = vmul.f32 0.032258064, %v197_v8 }
  0xc8   : > { %v200_v10 = vmax.f32 %v199_v9, 0.0 }
  0xca   : > { %373 = vrsqrt.f32 %v200_v10  ;;  %vm203_vm1 = vcmp.eq.f32.partialorder %v200_v10, inf  ;;  %v206_v13 = vand.u32 2147483648, %v200_v10  ;;  %vm205_vm2 = vcmp.eq.f32.partialorder %v200_v10, 0.0 }
  0xd7   : > { %v374_v11 = vpop.eup %373 }
  0xd8   : > { %v202_v12 = vmul.f32 %v374_v11, %v200_v10 }
  0xda   : > { %v204_v14 = vsel %vm203_vm1, %v200_v10, %v202_v12 }
  0xdb   : > { %v207_v15 = vsel %vm205_vm2, %v206_v13, %v204_v14 }
  0xdc   : > { %v208_v16 = vadd.f32 1e-08, %v207_v15 }
  0xde   : > { %375 = vrcp.f32 %v208_v16 }
  0xeb   : > { %v376_v18 = vpop.eup %375 }
  0xec   : > { %v212_v20 = vmul.f32 %v376_v18, %v211_v17 }
  0xee   : > { %v219_v22 = vmul.f32 %v321_v19, %v212_v20 }
  0xf0   : > { %v227_v23 = vadd.f32 %v322_v21, %v219_v22 }
  0xf2   : > { %228 = vst.msk [vmem:[%s185_s10] sm:$0xff] %vm187_vm0, %v227_v23 }
  0xf3   : > { %418 = shalt.err (!%p415_p10)
}
  0xf4   : > { %s419_s30 = scalar_lea.hbm %s241_s20, 128  ;;  %s423_s7 = scalar_lea.hbm %s650_s3, 256 }
  0xf5   : > { %p420_p2 = scmp.ne.s32.totalorder %s241_s20, %s419_s30  ;;  %p424_p7 = scmp.lt.s32.totalorder %s241_s20, %s650_s3 }
  0xf6   : > { %p425_p0 = scmp.lt.s32.totalorder %s423_s7, %s419_s30 }
  0xf7   : > { %p421_p4 = pnand %p420_p2, %p661_p12 }
  0xf8   : > { %p426_p6 = por %p425_p0, %p424_p7 }
  0xf9   : > { %p422_p9 = pneg %p421_p4 }
  0xfb   : > { %p427_p11 = pnand %p426_p6, %p422_p9 }
  0xfd   : > { %430 = shalt.err (!%p427_p11)
}
  0xfe   : > { %329 = dma.vmem_to_hbm [thread:$0]  (%p661_p12), %s244_s11, 128, %s241_s20, %s230_s22  }
  0xff PF: > { %s255_s6 = sand.u32 1, %s457_s12   ;;  %p662_p13 = scmp.ne.s32.totalorder %s656_s25, 0 }
 0x100   : > { %p663_p1 = scmp.ge.s32.totalorder %s469_s15, 2  ;;  %s256_s8 = scalar_lea.sflag [#allocation4], %s255_s6 }
 0x102   : > { %p336_p3 = pnand %p663_p1, %p662_p13 }
 0x104   : > { %p337_p5 = pneg %p336_p3 }
 0x106   : > { %452 = dma.done.wait (%p337_p5), %s256_s8, 128  }
 0x107   : > { %454 = vsyncadd (%p337_p5), %s256_s8, 4294967168  ;;  %p16_p8 = scmp.ge.s32.totalorder %s518_s18, 4   ;;  %s664_s12 = smov %s461_s13 }
 0x108   : > { %s665_s13 = smov %s465_s14  ;;  %s666_s14 = smov %s530_s21 }
 0x109   : > { %s667_s15 = smov %s518_s18  ;;  %18 = sbr.rel (!%p16_p8) target bundleno = 5 (0x5), region = 77 }
 0x10e   :  { %261 = vsyncpa [#allocation3], 1 }
 0x10f   :  { %263 = vsyncpa [#allocation3 + $0x1], 1 }
 0x110   :  { %264 = vsyncpa [#allocation4], 1 }
 0x111   :  { %266 = vsyncpa [#allocation4 + $0x1], 1 }

</bundles_post_ra>
